<compile_context>
chip_gen: v6e
topology: v6e:2x2x1
jax: 0.10.0
libtpu: 0.0.40
codegen_flags: <defaults>
</compile_context>

<pallas_src>
import jax
import jax.numpy as jnp
from jax.experimental import pallas as pl
from jax.experimental.pallas import tpu as pltpu


def _make_cin_kernel(t_valid: int, t_block: int):
    """Build the fused CIN kernel for one (1, tc, t_block) block.

    `t_valid` is the real sequence length; if t_block > t_valid the trailing
    lanes are padding and are masked out of the statistics.
    """
    inv_t = 1.0 / float(t_valid)
    needs_mask = t_block != t_valid

    def kernel(x_ref, g_ref, b_ref, o_ref):
        x = x_ref[...].astype(jnp.float32)                 # (1, tc, Tp) f32
        if needs_mask:
            valid = jax.lax.broadcasted_iota(jnp.int32, x.shape, 2) < t_valid
            xs = jnp.where(valid, x, 0.0)
        else:
            xs = x
        # Single pass: mean and mean-of-squares (f32), biased var, clamped >= 0.
        mean = jnp.sum(xs, axis=-1, keepdims=True) * inv_t        # (1, tc, 1)
        mean_sq = jnp.sum(xs * xs, axis=-1, keepdims=True) * inv_t
        var = jnp.maximum(mean_sq - mean * mean, 0.0)
        # Fold normalisation + conditional affine into per-channel scale/shift.
        scale = g_ref[...] * jax.lax.rsqrt(var + 1e-8)            # EUP rsqrt
        shift = b_ref[...] - mean * scale
        o_ref[...] = (x * scale + shift).astype(o_ref.dtype)

    return kernel


def _vmem_capacity_bytes():
    """Physical per-core VMEM; conservative 64 MiB (v7x) fallback."""
    try:
        info = pltpu.get_tpu_info()
        cap = getattr(info, "vmem_capacity_bytes", None)
        if cap:
            return int(cap)
    except Exception:
        pass
    return 64 << 20


def _pick_channel_tile(B, C, T_pad, budget_bytes):
    """Channel tile that (a) divides C, (b) is a multiple of 8 (layout rule for
    the second-to-last block dim), (c) keeps one f32-sized block under
    `budget_bytes`, and (d) leaves >= 2 (preferably >= 4) grid steps so both
    v7x TensorCores are used."""
    if C % 8 != 0:
        return C            # full-extent block also satisfies the (8,128) rule
    candidates = [tc for tc in range(8, C + 1, 8) if C % tc == 0]
    fitting = [tc for tc in candidates if tc * T_pad * 4 <= budget_bytes]
    # TODO(synk): if even an (8, T_pad) f32 block exceeds the budget (extreme
    # T), a T grid axis with running sum/sum-sq stats would be needed; fall
    # back to the smallest tile and let vmem_limit_bytes absorb it.
    pool = fitting if fitting else [8]
    for want_steps in (4, 2, 1):
        ok = [tc for tc in pool if B * (C // tc) >= want_steps]
        if ok:
            return max(ok)
    return max(pool)


@jax.jit
def conditional_instance_norm(x, c, w_gamma, b_gamma, w_beta, b_beta):
    """x: (B, dim_in, T), c: (B, style_num).  Returns (B, dim_in, T) in x.dtype."""
    B, C, T = x.shape

    # Style-conditioning affines: tiny (B x style_num) @ (style_num x dim_in)
    # matmuls -- plain jnp in f32 (XLA fuses them), NOT a padded MXU kernel.
    cf = c.astype(jnp.float32)
    gamma = (cf @ w_gamma.T.astype(jnp.float32)
             + b_gamma.astype(jnp.float32)).reshape(B, C, 1)
    beta = (cf @ w_beta.T.astype(jnp.float32)
            + b_beta.astype(jnp.float32)).reshape(B, C, 1)

    # Lane-dense output stores: pad T to a multiple of 128; stats are masked
    # over the valid length inside the kernel, padding is sliced off after.
    T_pad = ((T + 127) // 128) * 128
    x_in = x if T_pad == T else jnp.pad(x, ((0, 0), (0, 0), (0, T_pad - T)))

    # Generation-aware VMEM budget: ~80% of physical for the scoped limit,
    # ~1/6 of that per block (2x double-buffered in + out blocks, f32
    # temporaries inside the kernel, gamma/beta side-band, headroom).
    vmem_cap = _vmem_capacity_bytes()
    vmem_limit = min(int(vmem_cap * 0.8), vmem_cap - (8 << 20))
    block_budget = vmem_limit // 6
    tc = _pick_channel_tile(B, C, T_pad, block_budget)
    vmem_limit = max(vmem_limit, min(vmem_cap, 6 * tc * T_pad * 4))

    grid = (B, C // tc)
    itemsize = jnp.dtype(x.dtype).itemsize
    cost = pl.CostEstimate(
        flops=6 * B * C * T,
        transcendentals=B * C,
        bytes_accessed=2 * B * C * T * itemsize + 2 * B * C * 4,
    )

    out = pl.pallas_call(
        _make_cin_kernel(T, T_pad),
        out_shape=jax.ShapeDtypeStruct((B, C, T_pad), x.dtype),
        grid=grid,
        in_specs=[
            pl.BlockSpec((1, tc, T_pad), lambda b, ci: (b, ci, 0)),
            pl.BlockSpec((1, tc, 1), lambda b, ci: (b, ci, 0)),
            pl.BlockSpec((1, tc, 1), lambda b, ci: (b, ci, 0)),
        ],
        out_specs=pl.BlockSpec((1, tc, T_pad), lambda b, ci: (b, ci, 0)),
        compiler_params=pltpu.CompilerParams(
            dimension_semantics=("parallel", "parallel"),
            vmem_limit_bytes=int(vmem_limit)),
        cost_estimate=cost,
    )(x_in, gamma, beta)

    return out if T_pad == T else out[:, :, :T]


def _reference(x, c, w_gamma, b_gamma, w_beta, b_beta):
    # Pure-JAX mirror of the PyTorch forward, for a correctness check.
    u = jnp.mean(x, axis=2, keepdims=True)
    var = jnp.mean((x - u) * (x - u), axis=2, keepdims=True)
    std = jnp.sqrt(var + 1e-8)
    gamma = (c @ w_gamma.T + b_gamma)[:, :, None]
    beta = (c @ w_beta.T + b_beta)[:, :, None]
    return (x - u) / std * gamma + beta


if __name__ == "__main__":
    key = jax.random.PRNGKey(0)
    k_x, k_c, k_wg, k_bg, k_wb, k_bb = jax.random.split(key, 6)

    # Small shapes consistent with the module.
    B, dim_in, T, style_num = 2, 64, 128, 8
    x = jax.random.normal(k_x, (B, dim_in, T), jnp.float32)
    c = jax.random.normal(k_c, (B, style_num), jnp.float32)
    # nn.Linear(style_num, dim_in): weight (dim_in, style_num), bias (dim_in,)
    scale = 1.0 / (style_num ** 0.5)
    w_gamma = scale * jax.random.normal(k_wg, (dim_in, style_num), jnp.float32)
    b_gamma = 0.05 * jax.random.normal(k_bg, (dim_in,), jnp.float32)
    w_beta = scale * jax.random.normal(k_wb, (dim_in, style_num), jnp.float32)
    b_beta = 0.05 * jax.random.normal(k_bb, (dim_in,), jnp.float32)

    out = jax.block_until_ready(
        conditional_instance_norm(x, c, w_gamma, b_gamma, w_beta, b_beta))
    assert out.shape == (B, dim_in, T), out.shape
    assert out.dtype == x.dtype, out.dtype

    ref = _reference(x, c, w_gamma, b_gamma, w_beta, b_beta)
    assert bool(jnp.all(jnp.isfinite(out)))
    assert bool(jnp.allclose(out, ref, atol=1e-4, rtol=1e-4)), float(
        jnp.max(jnp.abs(out - ref)))
    print("KERNEL_OK")
</pallas_src>

<mosaic_0001>
module attributes {stable_mosaic.version = 11 : i64} {
  func.func @kernel(%arg0: i32, %arg1: i32, %arg2: memref<1x32x128xf32, #tpu.memory_space<vmem>>, %arg3: memref<1x32x1xf32, #tpu.memory_space<vmem>>, %arg4: memref<1x32x1xf32, #tpu.memory_space<vmem>>, %arg5: memref<1x32x128xf32, #tpu.memory_space<vmem>>) attributes {dimension_semantics = [#tpu.dimension_semantics<parallel>, #tpu.dimension_semantics<parallel>], iteration_bounds = array<i64: 2, 2>, scalar_prefetch = 0 : i64, scratch_operands = 0 : i64, tpu.core_type = #tpu.core_type<tc>, window_params = [{transform_indices = @transform_0, window_bounds = array<i64: 1, 32, 128>}, {transform_indices = @transform_1, window_bounds = array<i64: 1, 32, 1>}, {transform_indices = @transform_2, window_bounds = array<i64: 1, 32, 1>}, {transform_indices = @transform_3, window_bounds = array<i64: 1, 32, 128>}]} {
    %c0 = arith.constant 0 : index
    %c0_0 = arith.constant 0 : index
    %c0_1 = arith.constant 0 : index
    %0 = vector.load %arg2[%c0, %c0_0, %c0_1] : memref<1x32x128xf32, #tpu.memory_space<vmem>>, vector<1x32x128xf32>
    %cst = arith.constant dense<0.000000e+00> : vector<1x32xf32>
    %1 = vector.multi_reduction <add>, %0, %cst [2] : vector<1x32x128xf32> to vector<1x32xf32>
    %2 = vector.shape_cast %1 : vector<1x32xf32> to vector<1x32x1xf32>
    %cst_2 = arith.constant 7.812500e-03 : f32
    %3 = vector.broadcast %cst_2 : f32 to vector<1x32x1xf32>
    %4 = arith.mulf %2, %3 : vector<1x32x1xf32>
    %5 = arith.mulf %0, %0 : vector<1x32x128xf32>
    %cst_3 = arith.constant dense<0.000000e+00> : vector<1x32xf32>
    %6 = vector.multi_reduction <add>, %5, %cst_3 [2] : vector<1x32x128xf32> to vector<1x32xf32>
    %7 = vector.shape_cast %6 : vector<1x32xf32> to vector<1x32x1xf32>
    %cst_4 = arith.constant 7.812500e-03 : f32
    %8 = vector.broadcast %cst_4 : f32 to vector<1x32x1xf32>
    %9 = arith.mulf %7, %8 : vector<1x32x1xf32>
    %10 = arith.mulf %4, %4 : vector<1x32x1xf32>
    %11 = arith.subf %9, %10 : vector<1x32x1xf32>
    %cst_5 = arith.constant 0.000000e+00 : f32
    %12 = vector.broadcast %cst_5 : f32 to vector<1x32x1xf32>
    %13 = arith.maximumf %11, %12 : vector<1x32x1xf32>
    %c0_6 = arith.constant 0 : index
    %c0_7 = arith.constant 0 : index
    %c0_8 = arith.constant 0 : index
    %14 = vector.load %arg3[%c0_6, %c0_7, %c0_8] : memref<1x32x1xf32, #tpu.memory_space<vmem>>, vector<1x32x1xf32>
    %cst_9 = arith.constant 9.99999993E-9 : f32
    %15 = vector.broadcast %cst_9 : f32 to vector<1x32x1xf32>
    %16 = arith.addf %13, %15 : vector<1x32x1xf32>
    %17 = math.rsqrt %16 : vector<1x32x1xf32>
    %18 = arith.mulf %14, %17 : vector<1x32x1xf32>
    %c0_10 = arith.constant 0 : index
    %c0_11 = arith.constant 0 : index
    %c0_12 = arith.constant 0 : index
    %19 = vector.load %arg4[%c0_10, %c0_11, %c0_12] : memref<1x32x1xf32, #tpu.memory_space<vmem>>, vector<1x32x1xf32>
    %20 = arith.mulf %4, %18 : vector<1x32x1xf32>
    %21 = arith.subf %19, %20 : vector<1x32x1xf32>
    %22 = vector.broadcast %18 : vector<1x32x1xf32> to vector<1x32x128xf32>
    %23 = arith.mulf %0, %22 : vector<1x32x128xf32>
    %24 = vector.broadcast %21 : vector<1x32x1xf32> to vector<1x32x128xf32>
    %25 = arith.addf %23, %24 : vector<1x32x128xf32>
    %c0_13 = arith.constant 0 : index
    %c0_14 = arith.constant 0 : index
    %c0_15 = arith.constant 0 : index
    %26 = vector.load %arg5[%c0_13, %c0_14, %c0_15] : memref<1x32x128xf32, #tpu.memory_space<vmem>>, vector<1x32x128xf32>
    tpu.vector_store %arg5[%c0_13, %c0_14, %c0_15], %25 {strides = array<i32>} : memref<1x32x128xf32, #tpu.memory_space<vmem>>, vector<1x32x128xf32>,
    return
  }
  func.func @transform_0(%arg0: i32, %arg1: i32) -> (i32, i32, i32) {
    %c0_i32 = arith.constant 0 : i32
    %c0_i32_0 = arith.constant 0 : i32
    return %arg0, %arg1, %c0_i32 : i32, i32, i32
  }
  func.func @transform_1(%arg0: i32, %arg1: i32) -> (i32, i32, i32) {
    %c0_i32 = arith.constant 0 : i32
    %c0_i32_0 = arith.constant 0 : i32
    return %arg0, %arg1, %c0_i32 : i32, i32, i32
  }
  func.func @transform_2(%arg0: i32, %arg1: i32) -> (i32, i32, i32) {
    %c0_i32 = arith.constant 0 : i32
    %c0_i32_0 = arith.constant 0 : i32
    return %arg0, %arg1, %c0_i32 : i32, i32, i32
  }
  func.func @transform_3(%arg0: i32, %arg1: i32) -> (i32, i32, i32) {
    %c0_i32 = arith.constant 0 : i32
    %c0_i32_0 = arith.constant 0 : i32
    return %arg0, %arg1, %c0_i32 : i32, i32, i32
  }
}

</mosaic_0001>

<bundles_post_ra>
// kernel: conditional_instance_norm.1
= control target key start
LH: loop header
LB: loop body
LE: loop exit
PB: predicated region body
PF: predicated region fallthrough
CT: control target
= control target key end

     0   :  { %8 = vsyncpa [#allocation3], 0  ;;  %s930_s0 = inlined_call_operand.vmem [shape: f32[2,64,128], index: 0, kind: input, shape index: {}]   ;;  %s931_s1 = inlined_call_operand.vmem [shape: f32[2,64,1], index: 1, kind: input, shape index: {}]   ;;  %s932_s2 = inlined_call_operand.vmem [shape: f32[2,64,1], index: 2, kind: input, shape index: {}]   ;;  %s933_s3 = inlined_call_operand.hbm [shape: f32[2,64,128], index: 3, kind: output, shape index: {}]  }
   0x1   :  { %10 = vsyncpa [#allocation3 + $0x1], 0  ;;  %s753_s12 = smov 0   ;;  %s755_s13 = smov 0  }
   0x2   :  { %s757_s14 = smov 0   ;;  %s759_s15 = smov 0  }
   0x3   :  { %s761_s16 = smov 0   ;;  %s763_s17 = smov 0  }
   0x4   :  { %s765_s18 = smov 0   ;;  %s767_s19 = smov 0  }
   0x5 LB: > { %s530_s20 = sadd.s32 4294967295, %s727_s19   ;;  %s531_s21 = sadd.s32 4294967294, %s727_s19   ;;  %s727_s19 = sphi %s767_s19, %s16_s19   ;;  %s723_s18 = sphi %s765_s18, %s942_s18   ;;  %s719_s17 = sphi %s763_s17, %s941_s17   ;;  %s715_s16 = sphi %s761_s16, %s940_s16   ;;  %s711_s15 = sphi %s759_s15, %s939_s15   ;;  %s707_s14 = sphi %s757_s14, %s938_s14   ;;  %s703_s13 = sphi %s755_s13, %s937_s13   ;;  %s699_s12 = sphi %s753_s12, %s936_s12  }
   0x6   : > { %s25_s22 = sadd.s32 1, %s719_s17  ;;  %s28_s23 = sadd.s32 1, %s723_s18 }
   0x7   : > { %p26_p0 = scmp.ge.s32.totalorder %s25_s22, 2  ;;  %p131_p1 = scmp.ne.s32.totalorder %s707_s14, %s703_s13 }
   0x8   : > { %p132_p2 = scmp.eq.s32.totalorder %s530_s20, 3  ;;  %p137_p5 = scmp.ne.s32.totalorder %s703_s13, %s699_s12 }
   0x9   : > { %s944_s22 = smov (%p26_p0, %s25_s22), 0  ;;  %s946_s23 = smov (!%p26_p0, %s28_s23), %s723_s18 }
   0xa   : > { %s117_s24 = ssub.s32 %s719_s17, %s944_s22  ;;  %p804_p3 = por %p132_p2, %p131_p1 }
   0xb   : > { %p30_p4 = scmp.ge.s32.totalorder %s946_s23, 2  ;;  %p138_p6 = scmp.eq.s32.totalorder %s531_s21, 3 }
   0xc   : > { %p534_p7 = scmp.ge.s32.totalorder %s727_s19, 1  ;;  %p195_p9 = scmp.lt.s32.totalorder %s727_s19, 5 }
   0xd   : > { %s948_s23 = smov (%p30_p4, %s946_s23), 0  ;;  %p813_p8 = por %p138_p6, %p137_p5 }
   0xe   : > { %s116_s27 = ssub.s32 %s723_s18, %s948_s23  ;;  %s121_s28 = sadd.s32 1, %s707_s14 }
   0xf   : > { %s118_s29 = sor.u32 %s117_s24, %s116_s27  ;;  %p196_p10 = pnand %p534_p7, %p195_p9 }
  0x10   : > { %p119_p11 = scmp.eq.s32.totalorder %s118_s29, 0  ;;  %s825_s4 = sshll.u32 (!%p196_p10), %s711_s15, 2 }
  0x11   : > { %199 = sbr.rel (%p196_p10) target bundleno = 363 (0x16b), region = 32  ;;  %p242_p12 = scmp.lt.s32.totalorder (!%p196_p10), %s715_s16, 1 }
  0x12   : > { %s822_s30 = scalar_select %p119_p11, %s707_s14, %s121_s28  }
  0x13   : > { %p244_p13 = scmp.lt.s32.totalorder (!%p196_p10), %s825_s4, 7 }
  0x16   : > { %s243_s5 = scalar_select %p242_p12, %s715_s16, 1  ;;  %v729_v8 = vmov 0  }
  0x17   : > { %s245_s6 = scalar_select %p244_p13, %s825_s4, 7  ;;  %626 = vset.pattern.permute.xlu1 %v729_v8  ;;  %625 = vset.pattern.permute.xlu0 %v729_v8 }
  0x18   : > { %s537_s7 = sshll.u32 %s243_s5, 3  ;;  %s238_s5 = sand.u32 1, %s703_s13  }
  0x19   : > { %s247_s8 = sadd.s32 %s537_s7, %s245_s6  ;;  %s535_s6 = sshll.u32 %s238_s5, 5 }
  0x1a   : > { %s831_s9 = sshll.u32 %s247_s8, 3  ;;  %s547_s7 = sshll.u32 %s715_s16, 3 }
  0x1b   : > { %s249_s20 = scalar_lea.vmem %s930_s0, %s831_s9  ;;  %s259_s24 = scalar_lea.vmem %s931_s1, %s831_s9 }
  0x1c   : > { %v837_v0 = vld [vmem:[%s249_s20 + $0x10] sm:$0xff]  ;;  %v839_v1 = vld [vmem:[%s249_s20] sm:$0xff]  ;;  %v843_v2 = vld [vmem:[%s249_s20 + $0x18] sm:$0xff]  ;;  %s269_s29 = scalar_lea.vmem %s932_s2, %s831_s9  ;;  %s240_s8 = scalar_lea.vmem [#allocation2], %s535_s6 }
  0x1d   : > { %280 = vadd.xlane.f32.xlu1 %v837_v0  ;;  %276 = vadd.xlane.f32.xlu0 %v839_v1  ;;  %v845_v3 = vld [vmem:[%s249_s20 + $0x8] sm:$0xff]  ;;  %v288_v5 = vmul.f32 %v839_v1, %v839_v1  ;;  %v291_v6 = vmul.f32 %v843_v2, %v843_v2  ;;  %v290_v7 = vmul.f32 %v837_v0, %v837_v0  ;;  %v316_v42 = vld [vmem:[%s259_s24] sm:$0xff]  ;;  %v318_v47 = vld [vmem:[%s259_s24 + $0x10] sm:$0xff]  ;;  %s409_s9 = sadd.s32 %s547_s7, %s825_s4  ;;  %s412_s11 = sshll.u32 %s240_s8, 4  ;;  %s877_s11 = int_to_ptr.vmem [resolvable:$true] %s412_s11 }
  0x1e   : > { %v289_v4 = vmul.f32 %v845_v3, %v845_v3  ;;  %v317_v41 = vld [vmem:[%s259_s24 + $0x8] sm:$0xff]  ;;  %v319_v51 = vld [vmem:[%s259_s24 + $0x18] sm:$0xff]  ;;  %v332_v54 = vld [vmem:[%s269_s29] sm:$0xff]  ;;  %s548_s10 = sshll.u32 %s409_s9, 7  ;;  %s879_s16 = scalar_lea.sflag [#allocation3], %s238_s5 }
  0x1f   : > { %v333_v57 = vld [vmem:[%s269_s29 + $0x8] sm:$0xff]  ;;  %v334_v60 = vld [vmem:[%s269_s29 + $0x10] sm:$0xff]  ;;  %v335_v63 = vld [vmem:[%s269_s29 + $0x18] sm:$0xff]  ;;  %s874_s21 = scalar_lea.hbm %s933_s3, %s548_s10  ;;  %s635_s4 = scalar_lea.vmem %s877_s11, 512 }
  0x20   : > { %p636_p0 = scmp.ne.s32.totalorder %s877_s11, %s635_s4  ;;  %s730_s24 = smov [#allocation2]  }
  0x21   : > { %282 = vadd.xlane.f32.xlu1 %v843_v2  ;;  %278 = vadd.xlane.f32.xlu0 %v845_v3  ;;  %s639_s27 = sshll.u32 %s730_s24, 4  ;;  %s640_s27 = int_to_ptr.vmem [resolvable:$false] %s639_s27 }
  0x22   : > { %p637_p1 = pnand %p636_p0, %p804_p3  ;;  %s641_s28 = scalar_lea.vmem %s640_s27, 1024 }
  0x23   : > { %p642_p4 = scmp.lt.s32.totalorder %s877_s11, %s640_s27  ;;  %p643_p5 = scmp.lt.s32.totalorder %s641_s28, %s635_s4 }
  0x24   : > { %p638_p2 = pneg %p637_p1 }
  0x25   : > { %294 = vadd.xlane.f32.xlu1 %v289_v4  ;;  %292 = vadd.xlane.f32.xlu0 %v288_v5  ;;  %p644_p6 = por %p643_p5, %p642_p4 }
  0x27   : > { %p645_p7 = pnand %p644_p6, %p638_p2 }
  0x29   : > { %298 = vadd.xlane.f32.xlu1 %v291_v6  ;;  %296 = vadd.xlane.f32.xlu0 %v290_v7 }
  0xa6   : > { %v281_v9 = vpop.xlane.xlu1 %280  ;;  %v277_v10 = vpop.xlane.xlu0 %276 }
  0xa7   : > { %v284_v13 = vmul.f32 0.0078125, %v277_v10  ;;  %v286_v15 = vmul.f32 0.0078125, %v281_v9 }
  0xa9   : > { %v304_v19 = vmul.f32 %v284_v13, %v284_v13  ;;  %v306_v25 = vmul.f32 %v286_v15, %v286_v15 }
  0xaa   : > { %v283_v11 = vpop.xlane.xlu1 %282  ;;  %v279_v12 = vpop.xlane.xlu0 %278 }
  0xab   : > { %v285_v14 = vmul.f32 0.0078125, %v279_v12  ;;  %v287_v16 = vmul.f32 0.0078125, %v283_v11 }
  0xad   : > { %v305_v20 = vmul.f32 %v285_v14, %v285_v14  ;;  %v307_v26 = vmul.f32 %v287_v16, %v287_v16 }
  0xae   : > { %v295_v17 = vpop.xlane.xlu1 %294  ;;  %v293_v18 = vpop.xlane.xlu0 %292 }
  0xaf   : > { %v301_v21 = vmul.f32 0.0078125, %v295_v17  ;;  %v300_v22 = vmul.f32 0.0078125, %v293_v18 }
  0xb1   : > { %v309_v23 = vsub.f32 %v301_v21, %v305_v20  ;;  %v308_v24 = vsub.f32 %v300_v22, %v304_v19 }
  0xb2   : > { %v299_v27 = vpop.xlane.xlu1 %298  ;;  %v297_v28 = vpop.xlane.xlu0 %296 }
  0xb3   : > { %v313_v29 = vmax.f32 %v309_v23, 0.0  ;;  %v312_v30 = vmax.f32 %v308_v24, 0.0  ;;  %v303_v31 = vmul.f32 0.0078125, %v299_v27  ;;  %v302_v32 = vmul.f32 0.0078125, %v297_v28 }
  0xb5   : > { %v321_v33 = vadd.f32 1e-08, %v313_v29  ;;  %v320_v34 = vadd.f32 1e-08, %v312_v30  ;;  %v311_v35 = vsub.f32 %v303_v31, %v307_v26  ;;  %v310_v36 = vsub.f32 %v302_v32, %v306_v25 }
  0xb7   : > { %627 = vrsqrt.f32 %v321_v33  ;;  %v315_v37 = vmax.f32 %v311_v35, 0.0  ;;  %v314_v38 = vmax.f32 %v310_v36, 0.0 }
  0xb8   : > { %629 = vrsqrt.f32 %v320_v34 }
  0xb9   : > { %v322_v39 = vadd.f32 1e-08, %v314_v38  ;;  %v323_v40 = vadd.f32 1e-08, %v315_v37 }
  0xbb   : > { %631 = vrsqrt.f32 %v322_v39 }
  0xbc   : > { %633 = vrsqrt.f32 %v323_v40 }
  0xc4   : > { %v628_v43 = vpop.eup %627 }
  0xc5   : > { %v630_v44 = vpop.eup %629  ;;  %v329_v45 = vmul.f32 %v628_v43, %v317_v41 }
  0xc6   : > { %v328_v46 = vmul.f32 %v630_v44, %v316_v42 }
  0xc7   : > { %351 = vperm.xlu1 %626, %v329_v45   ;;  %v337_v56 = vmul.f32 %v329_v45, %v285_v14 }
  0xc8   : > { %346 = vperm.xlu0 %625, %v328_v46   ;;  %v632_v48 = vpop.eup %631  ;;  %v336_v53 = vmul.f32 %v328_v46, %v284_v13 }
  0xc9   : > { %v330_v49 = vmul.f32 %v632_v48, %v318_v47  ;;  %v634_v50 = vpop.eup %633  ;;  %v341_v58 = vsub.f32 %v333_v57, %v337_v56 }
  0xca   : > { %v331_v52 = vmul.f32 %v634_v50, %v319_v51  ;;  %v340_v55 = vsub.f32 %v332_v54, %v336_v53 }
  0xcb   : > { %356 = vperm.xlu1 %626, %v330_v49   ;;  %v338_v59 = vmul.f32 %v330_v49, %v286_v15 }
  0xcc   : > { %v339_v62 = vmul.f32 %v331_v52, %v287_v16 }
  0xcd   : > { %v342_v61 = vsub.f32 %v334_v60, %v338_v59 }
  0xce   : > { %v343_v4 = vsub.f32 %v335_v63, %v339_v62 }
  0xcf   : > { %361 = vperm.xlu1 %626, %v331_v52  }
  0xd3   : > { %370 = vperm.xlu1 %626, %v340_v55  }
  0xd7   : > { %375 = vperm.xlu1 %626, %v341_v58  }
  0xdb   : > { %380 = vperm.xlu1 %626, %v342_v61  }
  0xdf   : > { %385 = vperm.xlu1 %626, %v343_v4  }
 0x142   : > { %v352_v5 = vpop.permute.xlu1 %351 }
 0x143   : > { %v347_v7 = vpop.permute.xlu0 %346  ;;  %v365_v12 = vmul.f32 %v352_v5, %v845_v3 }
 0x144   : > { %v364_v9 = vmul.f32 %v347_v7, %v839_v1 }
 0x146   : > { %v357_v6 = vpop.permute.xlu1 %356 }
 0x147   : > { %v366_v15 = vmul.f32 %v357_v6, %v837_v0 }
 0x14a   : > { %v362_v8 = vpop.permute.xlu1 %361 }
 0x14b   : > { %v367_v1 = vmul.f32 %v362_v8, %v843_v2 }
 0x14e   : > { %v371_v10 = vpop.permute.xlu1 %370 }
 0x14f   : > { %v388_v11 = vadd.f32 %v371_v10, %v364_v9 }
 0x151   : > { %392 = vst [vmem:[%s240_s8] sm:$0xff] %v388_v11 }
 0x152   : > { %v376_v13 = vpop.permute.xlu1 %375 }
 0x153   : > { %v389_v14 = vadd.f32 %v376_v13, %v365_v12 }
 0x155   : > { %393 = vst [vmem:[%s240_s8 + $0x8] sm:$0xff] %v389_v14 }
 0x156   : > { %v381_v16 = vpop.permute.xlu1 %380 }
 0x157   : > { %v390_v17 = vadd.f32 %v381_v16, %v366_v15 }
 0x159   : > { %394 = vst [vmem:[%s240_s8 + $0x10] sm:$0xff] %v390_v17 }
 0x15a   : > { %v386_v0 = vpop.permute.xlu1 %385 }
 0x15b   : > { %v391_v3 = vadd.f32 %v386_v0, %v367_v1 }
 0x15d   : > { %395 = vst [vmem:[%s240_s8 + $0x18] sm:$0xff] %v391_v3 }
 0x15e   : > { %648 = shalt.err (!%p645_p7)
}
 0x15f   : > { %s649_s29 = scalar_lea.hbm %s874_s21, 512  ;;  %s653_s7 = scalar_lea.hbm %s933_s3, 2048 }
 0x160   : > { %p650_p9 = scmp.ne.s32.totalorder %s874_s21, %s649_s29  ;;  %p654_p12 = scmp.lt.s32.totalorder %s874_s21, %s933_s3 }
 0x161   : > { %p655_p13 = scmp.lt.s32.totalorder %s653_s7, %s649_s29 }
 0x162   : > { %p651_p10 = pnand %p650_p9, %p804_p3 }
 0x163   : > { %p656_p0 = por %p655_p13, %p654_p12 }
 0x164   : > { %p652_p11 = pneg %p651_p10 }
 0x166   : > { %p657_p1 = pnand %p656_p0, %p652_p11 }
 0x168   : > { %660 = shalt.err (!%p657_p1)
}
 0x169   : > { %s731_s10 = smov 128   ;;  %s732_s20 = smov 8  }
 0x16a   : > { %551 = dma.vmem_to_hbm [thread:$0]  (%p804_p3), %s877_s11, 512, %s874_s21, %s879_s16, %s731_s10, %s731_s10, %s732_s20  }
 0x16b PF: > { %p557_p2 = scmp.ge.s32.totalorder %s727_s19, 2  ;;  %s427_s15 = sand.u32 1, %s699_s12  }
 0x16c   : > { %s428_s4 = scalar_lea.sflag [#allocation3], %s427_s15 }
 0x16d   : > { %p554_p4 = pnand %p557_p2, %p813_p8 }
 0x16f   : > { %p555_p5 = pneg %p554_p4 }
 0x171   : > { %694 = dma.done.wait (%p555_p5), %s428_s4, 512  }
 0x172   : > { %696 = vsyncadd (%p555_p5), %s428_s4, 4294966784  ;;  %s16_s19 = sadd.s32 1, %s727_s19   ;;  %s936_s12 = smov %s703_s13 }
 0x173   : > { %p13_p6 = scmp.ge.s32.totalorder %s16_s19, 6   ;;  %s937_s13 = smov %s707_s14 }
 0x174   : > { %s938_s14 = smov %s822_s30  ;;  %s939_s15 = smov %s719_s17 }
 0x175   : > { %s940_s16 = smov %s723_s18  ;;  %s941_s17 = smov %s944_s22 }
 0x176   : > { %s942_s18 = smov %s948_s23  ;;  %15 = sbr.rel (!%p13_p6) target bundleno = 5 (0x5), region = 73 }
 0x17b   :  { %433 = vsyncpa [#allocation3], 1 }
 0x17c   :  { %435 = vsyncpa [#allocation3 + $0x1], 1 }

</bundles_post_ra>
